<compile_context>
chip_gen: v7x
topology: tpu7x:2x2x1
jax: 0.10.0
libtpu: 0.0.40
codegen_flags: <defaults>
</compile_context>

<pallas_src>
import functools

import jax
import jax.numpy as jnp
from jax.experimental import pallas as pl
from jax.experimental.pallas import tpu as pltpu


# ----------------------------------------------------------------------------
# Helpers
# ----------------------------------------------------------------------------
def _round_up(x, m):
    return ((x + m - 1) // m) * m


def _choose_tile_m(batch, cap=4096):
    """Pick the batch tile (the lane axis of every block).

    Multiples of 128, capped at `cap`; >=2 grid steps on larger batches so
    v7x's two TensorCores both get work; fewest grid steps first (per-step
    overhead ~0.35us dominates this tiny-width model), then least padding.
    """
    b128 = _round_up(batch, 128)
    if b128 <= 256:
        return b128                     # tiny batch: one (or two) 128-lane tiles
    best = None
    for tm in range(128, min(cap, b128) + 1, 128):
        steps = -(-batch // tm)
        if steps < 2:                   # keep both v7x TCs busy
            continue
        waste = steps * tm - batch
        key = (steps, waste)
        if best is None or key < best[0]:
            best = (key, tm)
    return best[1]


# ----------------------------------------------------------------------------
# Fused kernel: all party MLPs + cut layer + aggregation MLP, transposed layout
# ----------------------------------------------------------------------------
def _mlp_chain_T(h, wb_refs, n_layers, compute_dtype):
    """n_layers of h <- W^T @ h + b, ReLU on all but the last.

    h: (features, tile_m) -- batch on the lane axis.
    Weights arrive in compute_dtype (bf16); accumulation is f32; bias add and
    ReLU stay in f32 (v5e has no bf16 VPU); activations are re-cast to
    compute_dtype right before each MXU dot.
    """
    for li in range(n_layers):
        wT = wb_refs[2 * li][...]              # (out, in), compute_dtype
        b = wb_refs[2 * li + 1][...]           # (out, 1), f32
        h = jnp.dot(wT, h.astype(compute_dtype),
                    preferred_element_type=jnp.float32) + b
        if li < n_layers - 1:                  # static flag -> no runtime branch
            h = jnp.maximum(h, 0.0)
    return h


def _fused_splitmlp_kernel(*refs, n_active, party_layer_counts,
                           agg_layer_count, compute_dtype):
    # ref order:
    #   xT_0 .. xT_{P'-1}                       (active, i.e. non-identity, parties)
    #   per active party: (wT, b) * L_i
    #   agg first-layer per-party column chunks: w0T_0 .. w0T_{P'-1}
    #   agg first-layer bias: b0
    #   agg remaining layers: (wT, b) * (L_agg - 1)
    #   output ref  (out_dim, tile_m)
    out_ref = refs[-1]
    in_refs = refs[:-1]

    idx = n_active
    party_outs = []
    for pi in range(n_active):
        h = in_refs[pi][...]                              # (in_i, tile_m)
        cnt = party_layer_counts[pi]
        h = _mlp_chain_T(h, in_refs[idx: idx + 2 * cnt], cnt, compute_dtype)
        idx += 2 * cnt
        party_outs.append(h)

    # Aggregation first layer: cut-layer concat folded into a split-K matmul.
    w0_chunks = in_refs[idx: idx + n_active]
    idx += n_active
    b0 = in_refs[idx][...]
    idx += 1

    acc = jnp.dot(w0_chunks[0][...], party_outs[0].astype(compute_dtype),
                  preferred_element_type=jnp.float32)
    for pi in range(1, n_active):
        acc = acc + jnp.dot(w0_chunks[pi][...],
                            party_outs[pi].astype(compute_dtype),
                            preferred_element_type=jnp.float32)
    acc = acc + b0

    if agg_layer_count > 1:
        acc = jnp.maximum(acc, 0.0)                       # ReLU after agg hidden 0
        acc = _mlp_chain_T(acc, in_refs[idx: idx + 2 * (agg_layer_count - 1)],
                           agg_layer_count - 1, compute_dtype)

    # TODO(synk): out_activation is None for this config; apply here if set.
    out_ref[...] = acc.astype(out_ref.dtype)


# ----------------------------------------------------------------------------
# Wrapper: single pallas_call for the whole SplitMLP forward
# ----------------------------------------------------------------------------
def splitmlp_fused_forward(Xs, local_params, agg_params, *, tile_m=None,
                           compute_dtype=jnp.bfloat16, out_dtype=None):
    batch = Xs[0].shape[0]
    out_dtype = out_dtype or Xs[0].dtype

    # Identity parties (local_input_channels == 0) have 0-width inputs and
    # contribute zero columns to the cut layer -> drop them from the kernel.
    active = []
    for Xi, p in zip(Xs, local_params):
        if p is None:
            assert Xi.shape[1] == 0, "identity party must have zero features"
            continue
        active.append((Xi, p))
    assert active, "need at least one non-identity party"
    n_active = len(active)

    widths = [p[-1][0].shape[0] for _, p in active]       # w stored (out, in)
    layer_counts = [len(p) for _, p in active]
    w0, b0 = agg_params[0]
    assert w0.shape[1] == sum(widths), "cut-layer width mismatch"
    out_dim = agg_params[-1][0].shape[0]

    if tile_m is None:
        tile_m = _choose_tile_m(batch)
    padded = _round_up(batch, tile_m)
    grid = (padded // tile_m,)

    def cast_w(w):                          # bf16 MXU operand
        return w.astype(compute_dtype)

    def cast_b(b):                          # f32 column bias, broadcast over lanes
        return b.reshape(-1, 1).astype(jnp.float32)

    # Transposed (lane-dense) inputs: batch on the 128-lane axis; zero-pad the
    # batch so every block is a full multiple of 128 lanes.
    flat_inputs = []
    for Xi, _ in active:
        xt = Xi.T.astype(compute_dtype)                   # (in_i, batch)
        if padded != batch:
            xt = jnp.pad(xt, ((0, 0), (0, padded - batch)))
        flat_inputs.append(xt)
    for _, p in active:
        for (w, b) in p:
            flat_inputs += [cast_w(w), cast_b(b)]
    # Split the first aggregation weight by cut-layer columns (one chunk per
    # party) so the concat never materializes.
    off = 0
    for wd in widths:
        flat_inputs.append(cast_w(w0[:, off: off + wd]))
        off += wd
    flat_inputs.append(cast_b(b0))
    for (w, b) in agg_params[1:]:
        flat_inputs += [cast_w(w), cast_b(b)]

    in_specs = []
    for i, a in enumerate(flat_inputs):
        if i < n_active:
            # Party inputs stream over the batch (lane) axis.
            in_specs.append(pl.BlockSpec((a.shape[0], tile_m),
                                         lambda bi: (0, bi)))
        else:
            # Weights/biases: full block, resident across all batch tiles.
            in_specs.append(pl.BlockSpec(a.shape, lambda bi: (0, 0)))
    out_specs = pl.BlockSpec((out_dim, tile_m), lambda bi: (0, bi))

    # Advisory cost hint so XLA schedules the wrapper-side transposes/casts
    # around the custom call instead of serializing.
    flops = 0
    for _, p in active:
        for (w, _b) in p:
            flops += 2 * padded * w.shape[0] * w.shape[1]
    for (w, _b) in agg_params:
        flops += 2 * padded * w.shape[0] * w.shape[1]
    bytes_accessed = sum(a.size * a.dtype.itemsize for a in flat_inputs)
    bytes_accessed += out_dim * padded * jnp.dtype(out_dtype).itemsize
    cost = pl.CostEstimate(flops=int(flops), transcendentals=0,
                           bytes_accessed=int(bytes_accessed))

    # Only raise the scoped VMEM limit when the resident weights plus the
    # double-buffered streamed tiles actually need it (v5e scoped default is
    # 16 MiB; v7x physical is only 64 MiB so keep headroom).
    c_sz = jnp.dtype(compute_dtype).itemsize
    resident = sum(a.size * a.dtype.itemsize for a in flat_inputs[n_active:])
    streamed = sum(a.shape[0] * tile_m * c_sz for a in flat_inputs[:n_active])
    streamed += out_dim * tile_m * jnp.dtype(out_dtype).itemsize
    act_est = 4 * max(widths + [out_dim, w0.shape[0]]) * tile_m * 4
    vmem_need = 2 * (resident + streamed) + act_est
    vmem_limit = None if vmem_need <= (16 << 20) else int(
        min(vmem_need + (8 << 20), 96 << 20))

    kernel = functools.partial(
        _fused_splitmlp_kernel,
        n_active=n_active,
        party_layer_counts=tuple(layer_counts),
        agg_layer_count=len(agg_params),
        compute_dtype=compute_dtype,
    )

    out_t = pl.pallas_call(
        kernel,
        out_shape=jax.ShapeDtypeStruct((out_dim, padded), out_dtype),
        grid=grid,
        in_specs=in_specs,
        out_specs=out_specs,
        compiler_params=pltpu.CompilerParams(
            dimension_semantics=("parallel",),      # v7x: 2 TCs split batch tiles
            vmem_limit_bytes=vmem_limit),
        cost_estimate=cost,
    )(*flat_inputs)

    # Back to (batch, out_dim); drop batch padding.
    return out_t.T[:batch]


# ----------------------------------------------------------------------------
# Parameter init (PyTorch nn.Linear-style, weights kept (out, in)) and wrapper
# ----------------------------------------------------------------------------
def init_mlp_params(key, in_channels, hidden_channels):
    params = []
    d = in_channels
    for h in hidden_channels:
        key, kw, kb = jax.random.split(key, 3)
        bound = 1.0 / (d ** 0.5)
        w = jax.random.uniform(kw, (h, d), jnp.float32, -bound, bound)
        b = jax.random.uniform(kb, (h,), jnp.float32, -bound, bound)
        params.append((w, b))
        d = h
    return params, key


class SplitMLPPallas:
    def __init__(self, local_input_channels, local_hidden_channels,
                 agg_hidden_channels, key, compute_dtype=jnp.bfloat16):
        assert len(local_input_channels) == len(local_hidden_channels)
        self.compute_dtype = compute_dtype
        self.local_params = []
        for in_c, hidden in zip(local_input_channels, local_hidden_channels):
            if in_c == 0:
                self.local_params.append(None)            # nn.Identity()
            else:
                p, key = init_mlp_params(key, in_c, hidden)
                self.local_params.append(p)
        cut_dim = sum(h[-1] for in_c, h in
                      zip(local_input_channels, local_hidden_channels)
                      if in_c != 0)
        self.agg_params, key = init_mlp_params(key, cut_dim, agg_hidden_channels)

    def __call__(self, Xs, tile_m=None):
        # comm_logger is pure logging (no compute effect) -> not modeled.
        return splitmlp_fused_forward(Xs, self.local_params, self.agg_params,
                                      tile_m=tile_m,
                                      compute_dtype=self.compute_dtype)


# ----------------------------------------------------------------------------
# Pure-JAX reference (correctness check; same mixed-precision path as kernel)
# ----------------------------------------------------------------------------
def _mlp_ref(params, x, compute_dtype):
    n = len(params)
    for i, (w, b) in enumerate(params):
        x = jnp.dot(x.astype(compute_dtype), w.T.astype(compute_dtype),
                    preferred_element_type=jnp.float32) + b
        if i < n - 1:
            x = jnp.maximum(x, 0.0)
    return x


def _split_ref(model, Xs, compute_dtype):
    outs = []
    for p, Xi in zip(model.local_params, Xs):
        outs.append(Xi.astype(jnp.float32) if p is None
                    else _mlp_ref(p, Xi, compute_dtype))
    return _mlp_ref(model.agg_params, jnp.concatenate(outs, axis=1),
                    compute_dtype)


# ----------------------------------------------------------------------------
if __name__ == "__main__":
    key = jax.random.PRNGKey(0)

    # SplitMLP(local_input_channels=[8, 12, 0],
    #          local_hidden_channels=[[16], [16, 16], [4]],
    #          agg_hidden_channels=[32, 4])
    # party 2 has 0 features -> nn.Identity, contributes nothing to the cut layer.
    batch = 8
    local_input_channels = [8, 12, 0]
    local_hidden_channels = [[16], [16, 16], [4]]
    agg_hidden_channels = [32, 4]

    key, k0, k1, k2, kparam = jax.random.split(key, 5)
    Xs = [
        jax.random.normal(k0, (batch, local_input_channels[0]), jnp.float32),
        jax.random.normal(k1, (batch, local_input_channels[1]), jnp.float32),
        jax.random.normal(k2, (batch, local_input_channels[2]), jnp.float32),
    ]

    model = SplitMLPPallas(local_input_channels, local_hidden_channels,
                           agg_hidden_channels, kparam)

    out = jax.block_until_ready(model(Xs))
    assert out.shape == (batch, agg_hidden_channels[-1])

    # Reference along the exact same mixed-precision path (bf16 MXU operands,
    # f32 accumulation) -> tight tolerance.
    ref_bf16 = _split_ref(model, Xs, jnp.bfloat16)
    assert jnp.allclose(out, ref_bf16, atol=1e-3, rtol=1e-3), \
        float(jnp.max(jnp.abs(out - ref_bf16)))

    # Informational only: deviation vs. pure-f32 math (expected small bf16 drift).
    ref_f32 = _split_ref(model, Xs, jnp.float32)
    _max_f32_dev = float(jnp.max(jnp.abs(out - ref_f32)))

    print("KERNEL_OK")
</pallas_src>

<mosaic_0001>
module attributes {stable_mosaic.version = 11 : i64} {
  func.func @_fused_splitmlp_kernel(%arg0: i32, %arg1: memref<8x128xbf16, #tpu.memory_space<vmem>>, %arg2: memref<12x128xbf16, #tpu.memory_space<vmem>>, %arg3: memref<16x8xbf16, #tpu.memory_space<vmem>>, %arg4: memref<16x1xf32, #tpu.memory_space<vmem>>, %arg5: memref<16x12xbf16, #tpu.memory_space<vmem>>, %arg6: memref<16x1xf32, #tpu.memory_space<vmem>>, %arg7: memref<16x16xbf16, #tpu.memory_space<vmem>>, %arg8: memref<16x1xf32, #tpu.memory_space<vmem>>, %arg9: memref<32x16xbf16, #tpu.memory_space<vmem>>, %arg10: memref<32x16xbf16, #tpu.memory_space<vmem>>, %arg11: memref<32x1xf32, #tpu.memory_space<vmem>>, %arg12: memref<4x32xbf16, #tpu.memory_space<vmem>>, %arg13: memref<4x1xf32, #tpu.memory_space<vmem>>, %arg14: memref<4x128xf32, #tpu.memory_space<vmem>>) attributes {dimension_semantics = [#tpu.dimension_semantics<parallel>], iteration_bounds = array<i64: 1>, scalar_prefetch = 0 : i64, scratch_operands = 0 : i64, tpu.core_type = #tpu.core_type<tc>, window_params = [{transform_indices = @transform_0, window_bounds = array<i64: 8, 128>}, {transform_indices = @transform_1, window_bounds = array<i64: 12, 128>}, {pipeline_mode = #tpu.pipeline_mode<synchronous>, transform_indices = @transform_2, window_bounds = array<i64: 16, 8>}, {pipeline_mode = #tpu.pipeline_mode<synchronous>, transform_indices = @transform_3, window_bounds = array<i64: 16, 1>}, {pipeline_mode = #tpu.pipeline_mode<synchronous>, transform_indices = @transform_4, window_bounds = array<i64: 16, 12>}, {pipeline_mode = #tpu.pipeline_mode<synchronous>, transform_indices = @transform_5, window_bounds = array<i64: 16, 1>}, {pipeline_mode = #tpu.pipeline_mode<synchronous>, transform_indices = @transform_6, window_bounds = array<i64: 16, 16>}, {pipeline_mode = #tpu.pipeline_mode<synchronous>, transform_indices = @transform_7, window_bounds = array<i64: 16, 1>}, {pipeline_mode = #tpu.pipeline_mode<synchronous>, transform_indices = @transform_8, window_bounds = array<i64: 32, 16>}, {pipeline_mode = #tpu.pipeline_mode<synchronous>, transform_indices = @transform_9, window_bounds = array<i64: 32, 16>}, {pipeline_mode = #tpu.pipeline_mode<synchronous>, transform_indices = @transform_10, window_bounds = array<i64: 32, 1>}, {pipeline_mode = #tpu.pipeline_mode<synchronous>, transform_indices = @transform_11, window_bounds = array<i64: 4, 32>}, {pipeline_mode = #tpu.pipeline_mode<synchronous>, transform_indices = @transform_12, window_bounds = array<i64: 4, 1>}, {transform_indices = @transform_13, window_bounds = array<i64: 4, 128>}]} {
    %c0 = arith.constant 0 : index
    %c0_0 = arith.constant 0 : index
    %0 = vector.load %arg1[%c0, %c0_0] : memref<8x128xbf16, #tpu.memory_space<vmem>>, vector<8x128xbf16>
    %c0_1 = arith.constant 0 : index
    %c0_2 = arith.constant 0 : index
    %1 = vector.load %arg3[%c0_1, %c0_2] : memref<16x8xbf16, #tpu.memory_space<vmem>>, vector<16x8xbf16>
    %c0_3 = arith.constant 0 : index
    %c0_4 = arith.constant 0 : index
    %2 = vector.load %arg4[%c0_3, %c0_4] : memref<16x1xf32, #tpu.memory_space<vmem>>, vector<16x1xf32>
    %cst = arith.constant dense<0.000000e+00> : vector<16x128xf32>
    %3 = tpu.matmul %1, %0, %cst {dimension_numbers = #tpu.dot_dimension_numbers<[1], [0], [0], [1], [0, 0, 1, 1], [], []>} : vector<16x8xbf16>, vector<8x128xbf16>, vector<16x128xf32> -> vector<16x128xf32>
    %4 = vector.broadcast %2 : vector<16x1xf32> to vector<16x128xf32>
    %5 = arith.addf %3, %4 : vector<16x128xf32>
    %c0_5 = arith.constant 0 : index
    %c0_6 = arith.constant 0 : index
    %6 = vector.load %arg2[%c0_5, %c0_6] : memref<12x128xbf16, #tpu.memory_space<vmem>>, vector<12x128xbf16>
    %c0_7 = arith.constant 0 : index
    %c0_8 = arith.constant 0 : index
    %7 = vector.load %arg5[%c0_7, %c0_8] : memref<16x12xbf16, #tpu.memory_space<vmem>>, vector<16x12xbf16>
    %c0_9 = arith.constant 0 : index
    %c0_10 = arith.constant 0 : index
    %8 = vector.load %arg6[%c0_9, %c0_10] : memref<16x1xf32, #tpu.memory_space<vmem>>, vector<16x1xf32>
    %cst_11 = arith.constant dense<0.000000e+00> : vector<16x128xf32>
    %9 = tpu.matmul %7, %6, %cst_11 {dimension_numbers = #tpu.dot_dimension_numbers<[1], [0], [0], [1], [0, 0, 1, 1], [], []>} : vector<16x12xbf16>, vector<12x128xbf16>, vector<16x128xf32> -> vector<16x128xf32>
    %10 = vector.broadcast %8 : vector<16x1xf32> to vector<16x128xf32>
    %11 = arith.addf %9, %10 : vector<16x128xf32>
    %cst_12 = arith.constant 0.000000e+00 : f32
    %12 = vector.broadcast %cst_12 : f32 to vector<16x128xf32>
    %13 = arith.maximumf %11, %12 : vector<16x128xf32>
    %c0_13 = arith.constant 0 : index
    %c0_14 = arith.constant 0 : index
    %14 = vector.load %arg7[%c0_13, %c0_14] : memref<16x16xbf16, #tpu.memory_space<vmem>>, vector<16x16xbf16>
    %c0_15 = arith.constant 0 : index
    %c0_16 = arith.constant 0 : index
    %15 = vector.load %arg8[%c0_15, %c0_16] : memref<16x1xf32, #tpu.memory_space<vmem>>, vector<16x1xf32>
    %16 = arith.truncf %13 : vector<16x128xf32> to vector<16x128xbf16>
    %cst_17 = arith.constant dense<0.000000e+00> : vector<16x128xf32>
    %17 = tpu.matmul %14, %16, %cst_17 {dimension_numbers = #tpu.dot_dimension_numbers<[1], [0], [0], [1], [0, 0, 1, 1], [], []>} : vector<16x16xbf16>, vector<16x128xbf16>, vector<16x128xf32> -> vector<16x128xf32>
    %18 = vector.broadcast %15 : vector<16x1xf32> to vector<16x128xf32>
    %19 = arith.addf %17, %18 : vector<16x128xf32>
    %c0_18 = arith.constant 0 : index
    %c0_19 = arith.constant 0 : index
    %20 = vector.load %arg11[%c0_18, %c0_19] : memref<32x1xf32, #tpu.memory_space<vmem>>, vector<32x1xf32>
    %c0_20 = arith.constant 0 : index
    %c0_21 = arith.constant 0 : index
    %21 = vector.load %arg9[%c0_20, %c0_21] : memref<32x16xbf16, #tpu.memory_space<vmem>>, vector<32x16xbf16>
    %22 = arith.truncf %5 : vector<16x128xf32> to vector<16x128xbf16>
    %cst_22 = arith.constant dense<0.000000e+00> : vector<32x128xf32>
    %23 = tpu.matmul %21, %22, %cst_22 {dimension_numbers = #tpu.dot_dimension_numbers<[1], [0], [0], [1], [0, 0, 1, 1], [], []>} : vector<32x16xbf16>, vector<16x128xbf16>, vector<32x128xf32> -> vector<32x128xf32>
    %c0_23 = arith.constant 0 : index
    %c0_24 = arith.constant 0 : index
    %24 = vector.load %arg10[%c0_23, %c0_24] : memref<32x16xbf16, #tpu.memory_space<vmem>>, vector<32x16xbf16>
    %25 = arith.truncf %19 : vector<16x128xf32> to vector<16x128xbf16>
    %cst_25 = arith.constant dense<0.000000e+00> : vector<32x128xf32>
    %26 = tpu.matmul %24, %25, %cst_25 {dimension_numbers = #tpu.dot_dimension_numbers<[1], [0], [0], [1], [0, 0, 1, 1], [], []>} : vector<32x16xbf16>, vector<16x128xbf16>, vector<32x128xf32> -> vector<32x128xf32>
    %27 = arith.addf %23, %26 : vector<32x128xf32>
    %28 = vector.broadcast %20 : vector<32x1xf32> to vector<32x128xf32>
    %29 = arith.addf %27, %28 : vector<32x128xf32>
    %cst_26 = arith.constant 0.000000e+00 : f32
    %30 = vector.broadcast %cst_26 : f32 to vector<32x128xf32>
    %31 = arith.maximumf %29, %30 : vector<32x128xf32>
    %c0_27 = arith.constant 0 : index
    %c0_28 = arith.constant 0 : index
    %32 = vector.load %arg12[%c0_27, %c0_28] : memref<4x32xbf16, #tpu.memory_space<vmem>>, vector<4x32xbf16>
    %c0_29 = arith.constant 0 : index
    %c0_30 = arith.constant 0 : index
    %33 = vector.load %arg13[%c0_29, %c0_30] : memref<4x1xf32, #tpu.memory_space<vmem>>, vector<4x1xf32>
    %34 = arith.truncf %31 : vector<32x128xf32> to vector<32x128xbf16>
    %cst_31 = arith.constant dense<0.000000e+00> : vector<4x128xf32>
    %35 = tpu.matmul %32, %34, %cst_31 {dimension_numbers = #tpu.dot_dimension_numbers<[1], [0], [0], [1], [0, 0, 1, 1], [], []>} : vector<4x32xbf16>, vector<32x128xbf16>, vector<4x128xf32> -> vector<4x128xf32>
    %36 = vector.broadcast %33 : vector<4x1xf32> to vector<4x128xf32>
    %37 = arith.addf %35, %36 : vector<4x128xf32>
    %c0_32 = arith.constant 0 : index
    %c0_33 = arith.constant 0 : index
    %38 = vector.load %arg14[%c0_32, %c0_33] : memref<4x128xf32, #tpu.memory_space<vmem>>, vector<4x128xf32>
    tpu.vector_store %arg14[%c0_32, %c0_33], %37 {strides = array<i32>} : memref<4x128xf32, #tpu.memory_space<vmem>>, vector<4x128xf32>,
    return
  }
  func.func @transform_0(%arg0: i32) -> (i32, i32) {
    %c0_i32 = arith.constant 0 : i32
    %c0_i32_0 = arith.constant 0 : i32
    return %c0_i32, %arg0 : i32, i32
  }
  func.func @transform_1(%arg0: i32) -> (i32, i32) {
    %c0_i32 = arith.constant 0 : i32
    %c0_i32_0 = arith.constant 0 : i32
    return %c0_i32, %arg0 : i32, i32
  }
  func.func @transform_2(%arg0: i32) -> (i32, i32) {
    %c0_i32 = arith.constant 0 : i32
    %c0_i32_0 = arith.constant 0 : i32
    %c0_i32_1 = arith.constant 0 : i32
    return %c0_i32, %c0_i32_0 : i32, i32
  }
  func.func @transform_3(%arg0: i32) -> (i32, i32) {
    %c0_i32 = arith.constant 0 : i32
    %c0_i32_0 = arith.constant 0 : i32
    %c0_i32_1 = arith.constant 0 : i32
    return %c0_i32, %c0_i32_0 : i32, i32
  }
  func.func @transform_4(%arg0: i32) -> (i32, i32) {
    %c0_i32 = arith.constant 0 : i32
    %c0_i32_0 = arith.constant 0 : i32
    %c0_i32_1 = arith.constant 0 : i32
    return %c0_i32, %c0_i32_0 : i32, i32
  }
  func.func @transform_5(%arg0: i32) -> (i32, i32) {
    %c0_i32 = arith.constant 0 : i32
    %c0_i32_0 = arith.constant 0 : i32
    %c0_i32_1 = arith.constant 0 : i32
    return %c0_i32, %c0_i32_0 : i32, i32
  }
  func.func @transform_6(%arg0: i32) -> (i32, i32) {
    %c0_i32 = arith.constant 0 : i32
    %c0_i32_0 = arith.constant 0 : i32
    %c0_i32_1 = arith.constant 0 : i32
    return %c0_i32, %c0_i32_0 : i32, i32
  }
  func.func @transform_7(%arg0: i32) -> (i32, i32) {
    %c0_i32 = arith.constant 0 : i32
    %c0_i32_0 = arith.constant 0 : i32
    %c0_i32_1 = arith.constant 0 : i32
    return %c0_i32, %c0_i32_0 : i32, i32
  }
  func.func @transform_8(%arg0: i32) -> (i32, i32) {
    %c0_i32 = arith.constant 0 : i32
    %c0_i32_0 = arith.constant 0 : i32
    %c0_i32_1 = arith.constant 0 : i32
    return %c0_i32, %c0_i32_0 : i32, i32
  }
  func.func @transform_9(%arg0: i32) -> (i32, i32) {
    %c0_i32 = arith.constant 0 : i32
    %c0_i32_0 = arith.constant 0 : i32
    %c0_i32_1 = arith.constant 0 : i32
    return %c0_i32, %c0_i32_0 : i32, i32
  }
  func.func @transform_10(%arg0: i32) -> (i32, i32) {
    %c0_i32 = arith.constant 0 : i32
    %c0_i32_0 = arith.constant 0 : i32
    %c0_i32_1 = arith.constant 0 : i32
    return %c0_i32, %c0_i32_0 : i32, i32
  }
  func.func @transform_11(%arg0: i32) -> (i32, i32) {
    %c0_i32 = arith.constant 0 : i32
    %c0_i32_0 = arith.constant 0 : i32
    %c0_i32_1 = arith.constant 0 : i32
    return %c0_i32, %c0_i32_0 : i32, i32
  }
  func.func @transform_12(%arg0: i32) -> (i32, i32) {
    %c0_i32 = arith.constant 0 : i32
    %c0_i32_0 = arith.constant 0 : i32
    %c0_i32_1 = arith.constant 0 : i32
    return %c0_i32, %c0_i32_0 : i32, i32
  }
  func.func @transform_13(%arg0: i32) -> (i32, i32) {
    %c0_i32 = arith.constant 0 : i32
    %c0_i32_0 = arith.constant 0 : i32
    return %c0_i32, %arg0 : i32, i32
  }
}

</mosaic_0001>

<bundles_post_ra>
// kernel: tpu_custom_call.1
= control target key start
LH: loop header
LB: loop body
LE: loop exit
PB: predicated region body
PF: predicated region fallthrough
CT: control target
= control target key end

     0   :  { %vm70_vm0 = vcmask 1043456   ;;  %vm145_vm1 = vcmask 1045504   ;;  %v608_v1 = vmov 0.0   ;;  %vm609_vm2 = vmmov 0   ;;  %s775_s0 = inlined_call_operand.vmem [shape: bf16[8,128], index: 0, kind: input, shape index: {}]   ;;  %s776_s1 = inlined_call_operand.vmem [shape: bf16[12,128], index: 1, kind: input, shape index: {}]   ;;  %s777_s2 = inlined_call_operand.vmem [shape: bf16[16,8], index: 2, kind: input, shape index: {}]   ;;  %s778_s3 = inlined_call_operand.vmem [shape: f32[16,1], index: 3, kind: input, shape index: {}]   ;;  %s779_s4 = inlined_call_operand.vmem [shape: bf16[16,12], index: 4, kind: input, shape index: {}]   ;;  %s780_s5 = inlined_call_operand.vmem [shape: f32[16,1], index: 5, kind: input, shape index: {}]   ;;  %s781_s6 = inlined_call_operand.vmem [shape: bf16[16,16], index: 6, kind: input, shape index: {}]   ;;  %s782_s7 = inlined_call_operand.vmem [shape: f32[16,1], index: 7, kind: input, shape index: {}]   ;;  %s783_s8 = inlined_call_operand.vmem [shape: bf16[32,16], index: 8, kind: input, shape index: {}]   ;;  %s784_s9 = inlined_call_operand.vmem [shape: bf16[32,16], index: 9, kind: input, shape index: {}]   ;;  %s785_s10 = inlined_call_operand.vmem [shape: f32[32,1], index: 10, kind: input, shape index: {}]   ;;  %s786_s11 = inlined_call_operand.vmem [shape: bf16[4,32], index: 11, kind: input, shape index: {}]   ;;  %s787_s12 = inlined_call_operand.vmem [shape: f32[4,1], index: 12, kind: input, shape index: {}]   ;;  %s788_s13 = inlined_call_operand.hbm [shape: f32[4,128], index: 13, kind: output, shape index: {}]  }
   0x1   :  { %v46_v0 = vld [vmem:[%s775_s0] sm:$0xf]  ;;  %528 = vmatprep.subr.bf16.mxu0 %v608_v1  ;;  %534 = vmatprep.subr.bf16.mxu1 %v608_v1  ;;  %vm66_vm3 = vcmask 64512   ;;  %vm141_vm4 = vcmask 97280   ;;  %v610_v9 = vmov 0   ;;  %v120_v10 = vld [vmem:[%s780_s5 + $0x8] sm:$0xff] }
   0x2   :  { %v72_v2 = vsel %vm70_vm0, %v46_v0, 0  ;;  %v577_v3 = vld [vmem:[%s777_s2] sm:$0xff]   ;;  %530 = vmatprep.mubr.msk.bf16.mxu0 %vm609_vm2, %v608_v1  ;;  %536 = vmatprep.mubr.msk.bf16.mxu1 %vm609_vm2, %v608_v1  ;;  %v195_v11 = vld [vmem:[%s782_s7 + $0x8] sm:$0xff] }
   0x3   :  { %529 = vmatpush3.bf16.msra.mxu0 %v72_v2  ;;  %v576_v4 = vld [vmem:[%s776_s1] sm:$0x3f]   ;;  %574 = vset.pattern.permute.xlu0 %v610_v9 }
   0x4   :  { %540 = vmatprep.subr.bf16.mxu0 %v608_v1  ;;  %v147_v5 = vsel %vm145_vm1, %v576_v4, 0  ;;  %v578_v6 = vld [vmem:[%s779_s4] sm:$0xff]   ;;  %575 = vset.pattern.permute.xlu1 %v610_v9 }
   0x5   :  { %v119_v7 = vld [vmem:[%s780_s5] sm:$0xff]  ;;  %535 = vmatpush3.bf16.msra.mxu1 %v147_v5 }
   0x6   :  { %531 = vmatmul.mubr.msk.bf16.vlgmr.msra.gmra.mrb[0].mxu0 %vm66_vm3, %v577_v3  ;;  %v194_v8 = vld [vmem:[%s782_s7] sm:$0xff]  ;;  %123 = vperm.xlu0 %574, %v119_v7  }
   0x7   :  { %199 = vperm.xlu1 %575, %v194_v8   ;;  %542 = vmatprep.mubr.msk.bf16.mxu0 %vm609_vm2, %v608_v1 }
   0x8   :  { %537 = vmatmul.mubr.msk.bf16.vlgmr.msra.gmra.mrb[0].mxu1 %vm141_vm4, %v578_v6 }
   0x9   :  { %18 = vsyncpa [#allocation3], 0  ;;  %v49_v12 = vld [vmem:[%s778_s3] sm:$0xff]  ;;  %v50_v13 = vld [vmem:[%s778_s3 + $0x8] sm:$0xff]  ;;  %vm212_vm5 = vcmask 130048   ;;  %vm438_vm6 = vcmask 261120  }
   0xa   :  { %128 = vperm.xlu0 %574, %v120_v10   ;;  %v257_v14 = vld [vmem:[%s785_s10] sm:$0xff]  ;;  %v259_v15 = vld [vmem:[%s785_s10 + $0x10] sm:$0xff]  ;;  %v258_v17 = vld [vmem:[%s785_s10 + $0x8] sm:$0xff]  ;;  %s611_s18 = smov [#allocation2]  }
   0xb   :  { %204 = vperm.xlu1 %575, %v195_v11   ;;  %v430_v16 = vld [vmem:[%s787_s12] sm:$0xf]  ;;  %v260_v18 = vld [vmem:[%s785_s10 + $0x18] sm:$0xff]  ;;  %v581_v50 = vld [vmem:[%s784_s9 + $0x8] sm:$0xff]   ;;  %s489_s19 = sshll.u32 %s611_s18, 4  ;;  %s490_s19 = int_to_ptr.vmem [resolvable:$true] %s489_s19 }
   0xc   :  { %v579_v41 = vld [vmem:[%s781_s6] sm:$0xff]   ;;  %v583_v52 = vld [vmem:[%s783_s8 + $0x8] sm:$0xff]   ;;  %s584_s4 = scalar_lea.vmem %s490_s19, 64  ;;  %p589_p1 = scmp.lt.s32.totalorder %s490_s19, %s490_s19 }
   0xd   :  { %v580_v42 = vld [vmem:[%s784_s9] sm:$0xff]   ;;  %p585_p0 = scmp.ne.s32.totalorder %s490_s19, %s584_s4  ;;  %p590_p2 = scmp.lt.s32.totalorder %s584_s4, %s584_s4 }
   0xe   :  { %53 = vperm.xlu0 %574, %v49_v12   ;;  %548 = vmatprep.mubr.msk.bf16.mxu1 %vm212_vm5, %v580_v42  ;;  %v582_v51 = vld [vmem:[%s783_s8] sm:$0xff]  }
   0xf   :  { %58 = vperm.xlu1 %575, %v50_v13   ;;  %v429_v8 = vld [vmem:[%s786_s11] sm:$0x3]  ;;  %p591_p3 = por %p590_p2, %p589_p1 }
  0x11   :  { %p592_p4 = pnand %p591_p3, %p585_p0 }
  0x12   :  { %403 = vperm.xlu0 %574, %v257_v14  }
  0x13   :  { %408 = vperm.xlu1 %575, %v258_v17  }
  0x16   :  { %413 = vperm.xlu0 %574, %v259_v15  }
  0x17   :  { %418 = vperm.xlu1 %575, %v260_v18  }
  0x1a   :  { %435 = vperm.xlu0 %574, %v430_v16  }
  0x85   :  { %v124_v20 = vpop.permute.xlu0 %123 }
  0x86   :  { %v200_v19 = vpop.permute.xlu1 %199 }
  0x89   :  { %v129_v22 = vpop.permute.xlu0 %128 }
  0x8a   :  { %v205_v21 = vpop.permute.xlu1 %204 }
  0x8d   :  { %v54_v26 = vpop.permute.xlu0 %53 }
  0x8e   :  { %v59_v24 = vpop.permute.xlu1 %58 }
  0x91   :  { %v404_v53 = vpop.permute.xlu0 %403 }
  0x92   :  { %v409_v54 = vpop.permute.xlu1 %408 }
  0x95   :  { %v414_v55 = vpop.permute.xlu0 %413 }
  0x96   :  { %v419_v59 = vpop.permute.xlu1 %418 }
  0x99   :  { %v436_v9 = vpop.permute.xlu0 %435 }
  0xd9   :  { %v108_v23 = vpop.f32.mrb[0].mxu0 }
  0xda   :  { %v532_v25 = vpop.f32.mrb[1].mxu0  ;;  %v109_v28 = vadd.f32 %v108_v23, %v54_v26 }
  0xdb   :  { %v111_v27 = vpop.f32.mrb[2].mxu0  ;;  %v183_v29 = vpop.f32.mrb[0].mxu1 }
  0xdc   :  { %v112_v30 = vadd.f32 %v111_v27, %v59_v24  ;;  %v533_v31 = vpop.f32.mrb[3].mxu0  ;;  %v184_v32 = vadd.f32 %v183_v29, %v124_v20  ;;  %v538_v33 = vpop.f32.mrb[1].mxu1 }
  0xdd   :  { %v186_v35 = vpop.f32.mrb[2].mxu1 }
  0xde   :  { %v265_v34 = vpack.c.bf16 %v112_v30, %v109_v28  ;;  %v187_v36 = vadd.f32 %v186_v35, %v129_v22  ;;  %v539_v37 = vpop.f32.mrb[3].mxu1  ;;  %v190_v38 = vmax.f32 %v184_v32, 0.0 }
  0xe0   :  { %v191_v39 = vmax.f32 %v187_v36, 0.0 }
  0xe2   :  { %v196_v40 = vpack.c.bf16 %v191_v39, %v190_v38 }
  0xe4   :  { %541 = vmatpush3.bf16.msra.mxu0 %v196_v40 }
  0xe5   :  { %558 = vmatprep.subr.bf16.mxu0 %v608_v1 }
  0xe7   :  { %543 = vmatmul.mubr.msk.bf16.vlgmr.msra.gmra.mrb[4].mxu0 %vm212_vm5, %v579_v41 }
  0xe8   :  { %562 = vmatprep.mubr.msk.bf16.mxu0 %vm609_vm2, %v608_v1 }
 0x1ba   :  { %v250_v43 = vpop.f32.mrb[4].mxu0 }
 0x1bb   :  { %v544_v44 = vpop.f32.mrb[5].mxu0  ;;  %v251_v46 = vadd.f32 %v250_v43, %v200_v19 }
 0x1bc   :  { %v253_v45 = vpop.f32.mrb[6].mxu0 }
 0x1bd   :  { %v254_v47 = vadd.f32 %v253_v45, %v205_v21  ;;  %v545_v48 = vpop.f32.mrb[7].mxu0 }
 0x1bf   :  { %v270_v49 = vpack.c.bf16 %v254_v47, %v251_v46 }
 0x1c1   :  { %546 = vmatprep.subr.bf16.mxu1 %v270_v49 }
 0x1c2   :  { %547 = vmatpush3.bf16.msra.mxu1 %v270_v49 }
 0x1c3   :  { %552 = vmatprep.subr.bf16.mxu1 %v265_v34 }
 0x1c5   :  { %549 = vmatmul.mubr.msk.bf16.vlgmr.msra.gmra.mrb[4].mxu1 %vm212_vm5, %v581_v50 }
 0x1c6   :  { %553 = vmatpush3.bf16.msra.mxu1 %v265_v34  ;;  %554 = vmatprep.mubr.msk.bf16.mxu1 %vm212_vm5, %v582_v51 }
 0x1d1   :  { %555 = vmatmul.mubr.msk.bf16.vlgmr.msra.gmra.mrb[4].mxu1 %vm212_vm5, %v583_v52 }
 0x2a4   :  { %v556_v56 = vpop.f32.mrb[4].mxu1 }
 0x2a5   :  { %v423_v57 = vadd.f32 %v556_v56, %v414_v55  ;;  %v386_v58 = vpop.f32.mrb[5].mxu1 }
 0x2a6   :  { %v421_v60 = vadd.f32 %v404_v53, %v386_v58  ;;  %v557_v61 = vpop.f32.mrb[6].mxu1 }
 0x2a7   :  { %v424_v62 = vadd.f32 %v557_v61, %v419_v59  ;;  %v389_v63 = vpop.f32.mrb[7].mxu1  ;;  %v427_v2 = vmax.f32 %v423_v57, 0.0 }
 0x2a8   :  { %v422_v0 = vadd.f32 %v409_v54, %v389_v63  ;;  %v425_v4 = vmax.f32 %v421_v60, 0.0 }
 0x2a9   :  { %v428_v3 = vmax.f32 %v424_v62, 0.0 }
 0x2aa   :  { %v426_v5 = vmax.f32 %v422_v0, 0.0 }
 0x2ab   :  { %v432_v6 = vpack.c.bf16 %v428_v3, %v427_v2 }
 0x2ac   :  { %v431_v7 = vpack.c.bf16 %v426_v5, %v425_v4 }
 0x2ae   :  { %559 = vmatpush3.bf16.msra.mxu0 %v431_v7 }
 0x2af   :  { %560 = vmatprep.subr.bf16.mxu0 %v608_v1 }
 0x2b2   :  { %561 = vmatpush3.bf16.msra.mxu0 %v432_v6 }
 0x2b5   :  { %563 = vmatmul.mubr.msk.bf16.vlgmr.msra.gmra.mrb[8].mxu0 %vm438_vm6, %v429_v8 }
 0x388   :  { %v476_v10 = vpop.f32.mrb[8].mxu0 }
 0x389   :  { %v477_v11 = vadd.f32 %v476_v10, %v436_v9  ;;  %v564_v12 = vpop.f32.mrb[9].mxu0 }
 0x38a   :  { %v479_v13 = vpop.f32.mrb[10].mxu0 }
 0x38b   :  { %482 = vst [vmem:[#allocation2] sm:$0xf] %v477_v11  ;;  %v565_v14 = vpop.f32.mrb[11].mxu0 }
 0x38c   :  { %595 = shalt.err (!%p592_p4)
}
 0x38d   :  { %s596_s21 = scalar_lea.hbm %s788_s13, 64 }
 0x38e   :  { %p597_p5 = scmp.ne.s32.totalorder %s788_s13, %s596_s21  ;;  %p600_p6 = scmp.lt.u32.totalorder %s596_s21, %s788_s13 }
 0x390   :  { %p602_p7 = pnand %p600_p6, %p597_p5 }
 0x392   :  { %605 = shalt.err (!%p602_p7)
}
 0x393   :  { %492 = dma.vmem_to_hbm [thread:$0]  %s490_s19, 64, %s788_s13, [#allocation3]  }
 0x394   :  { %606 = dma.done.wait [#allocation3], 64  }
 0x395   :  { %607 = vsyncadd [#allocation3], 4294967232 }
 0x396   :  { %496 = vsyncpa [#allocation3], 1 }

</bundles_post_ra>
